<compile_context>
chip_gen: v6e
topology: v6e:2x2x1
jax: 0.10.0
libtpu: 0.0.40
codegen_flags: <defaults>
</compile_context>

<pallas_src>
import jax
import jax.numpy as jnp
from jax.experimental import pallas as pl
from jax.experimental.pallas import tpu as pltpu


def node_model_kernel(dest_ref, batch_ref, x_ref, edge_aug_ref, u_ref,
                      w1x_ref, w1e_ref, w1u_ref, b1_ref, w2_ref, b2_ref,
                      node_out_ref, edge_bar_ref):
    i = pl.program_id(0)
    tile_n = x_ref.shape[0]
    E = edge_aug_ref.shape[0]
    B = u_ref.shape[0]
    Fe = edge_bar_ref.shape[1]

    dest = dest_ref[...]           # [1, E]       int32 (dest node id per edge)
    batch = batch_ref[...]         # [tile_n, 1]  int32 (graph id per node)
    x = x_ref[...]                 # [tile_n, Fx] f32
    edge_aug = edge_aug_ref[...]   # [E, Fe+1]    f32, last column == 1.0
    u = u_ref[...]                 # [B, Fu]      f32

    # scatter_mean(edge_attr, dest) for this node tile: one fused one-hot
    # matmul; the appended ones column produces the counts in the same pass.
    row_ids = jax.lax.broadcasted_iota(jnp.int32, (tile_n, E), 0) + i * tile_n
    onehot_e = (row_ids == dest).astype(jnp.float32)                 # [tile_n, E]
    seg = jnp.dot(onehot_e, edge_aug, preferred_element_type=jnp.float32)
    counts = jnp.maximum(seg[:, Fe:Fe + 1], 1.0)                     # [tile_n, 1]
    inv_counts = pl.reciprocal(counts, approx=False)                 # exact 1/x
    edge_bar = seg[:, :Fe] * inv_counts                              # [tile_n, Fe]
    edge_bar_ref[...] = edge_bar

    # u[batch] gather via one-hot matmul (MXU-friendly, no per-row gather).
    graph_ids = jax.lax.broadcasted_iota(jnp.int32, (tile_n, B), 1)
    onehot_b = (graph_ids == batch).astype(jnp.float32)              # [tile_n, B]
    u_g = jnp.dot(onehot_b, u, preferred_element_type=jnp.float32)   # [tile_n, Fu]

    # node MLP. Linear1 over cat([x, edge_bar, u_g]) expressed as a sum of
    # three small matmuls against the pre-split weight (same math, avoids an
    # unaligned-lane concatenate inside the kernel).
    h = (jnp.dot(x, w1x_ref[...], preferred_element_type=jnp.float32)
         + jnp.dot(edge_bar, w1e_ref[...], preferred_element_type=jnp.float32)
         + jnp.dot(u_g, w1u_ref[...], preferred_element_type=jnp.float32)
         + b1_ref[...])
    h = jnp.maximum(h, 0.0)
    # Dropout(0.5): identity in eval mode.
    y = jnp.dot(h, w2_ref[...], preferred_element_type=jnp.float32) + b2_ref[...]
    node_out_ref[...] = jnp.maximum(y, 0.0)
    # TODO(synk): for MXU-bound sizes, cast onehot/edge_aug to bf16 (f32 accum).


def node_model_forward(x, edge_index, edge_attr, u, batch, params, *, tile_n=16):
    """Returns (node_mlp_out [N, Fx], edge_out_bar [N, Fe])."""
    N, Fx = x.shape
    E, Fe = edge_attr.shape
    B, Fu = u.shape
    w1, b1, w2, b2 = params
    F, H = w1.shape
    assert F == Fx + Fe + Fu
    Fo = w2.shape[1]
    assert tile_n % 8 == 0

    # Pad the node dimension to a multiple of tile_n (padded rows sliced off).
    n_pad = pl.cdiv(N, tile_n) * tile_n
    pad = n_pad - N
    x_p = jnp.pad(x, ((0, pad), (0, 0))) if pad else x
    batch_p = jnp.pad(batch, (0, pad)) if pad else batch

    dest2d = edge_index[1].reshape(1, E).astype(jnp.int32)
    batch2d = batch_p.reshape(n_pad, 1).astype(jnp.int32)
    # Append a ones column so the segment-sum matmul also yields the counts.
    edge_aug = jnp.concatenate(
        [edge_attr.astype(jnp.float32), jnp.ones((E, 1), jnp.float32)], axis=1)
    # Pre-split W1 along its input dim: x | edge_bar | u blocks.
    w1x = w1[:Fx]
    w1e = w1[Fx:Fx + Fe]
    w1u = w1[Fx + Fe:]
    b1_2d = b1.reshape(1, H)
    b2_2d = b2.reshape(1, Fo)

    grid = (n_pad // tile_n,)
    bcast = lambda shape: pl.BlockSpec(shape, lambda i: (0, 0))   # grid-invariant
    tiled = lambda shape: pl.BlockSpec(shape, lambda i: (i, 0))   # tiled over nodes

    node_out, edge_bar = pl.pallas_call(
        node_model_kernel,
        out_shape=(jax.ShapeDtypeStruct((n_pad, Fo), jnp.float32),
                   jax.ShapeDtypeStruct((n_pad, Fe), jnp.float32)),
        grid=grid,
        in_specs=[
            bcast((1, E)),           # dest node id per edge
            tiled((tile_n, 1)),      # graph id per node
            tiled((tile_n, Fx)),     # x
            bcast((E, Fe + 1)),      # [edge_attr | 1]
            bcast((B, Fu)),          # u
            bcast((Fx, H)),          # W1 block for x
            bcast((Fe, H)),          # W1 block for edge_bar
            bcast((Fu, H)),          # W1 block for u[batch]
            bcast((1, H)),           # b1
            bcast((H, Fo)),          # W2
            bcast((1, Fo)),          # b2
        ],
        out_specs=(tiled((tile_n, Fo)), tiled((tile_n, Fe))),
        compiler_params=pltpu.CompilerParams(
            dimension_semantics=("parallel",),
            # Per-step VMEM ~O(tile_n*E) is far below this on all chips
            # (v5e default scoped limit is only 16 MiB, so set explicitly).
            vmem_limit_bytes=32 * 1024 * 1024,
        ),
    )(dest2d, batch2d, x_p, edge_aug, u, w1x, w1e, w1u, b1_2d, w2, b2_2d)

    return node_out[:N], edge_bar[:N]


def _reference(x, edge_index, edge_attr, u, batch, params):
    w1, b1, w2, b2 = params
    N = x.shape[0]
    dest = edge_index[1]
    ones = jnp.ones((edge_attr.shape[0],), jnp.float32)
    counts = jnp.maximum(jax.ops.segment_sum(ones, dest, num_segments=N), 1.0)
    edge_bar = jax.ops.segment_sum(edge_attr, dest, num_segments=N) / counts[:, None]
    out = jnp.concatenate([x, edge_bar, u[batch]], axis=1)
    h = jnp.maximum(out @ w1 + b1, 0.0)
    y = jnp.maximum(h @ w2 + b2, 0.0)
    return y, edge_bar


if __name__ == "__main__":
    # MUTAG-like small shapes: 7 node features, 4 edge features, global dim 8.
    N, E, B = 48, 96, 4
    Fx, Fe, Fu, H = 7, 4, 8, 32
    F = Fx + Fe + Fu

    key = jax.random.PRNGKey(0)
    ks = jax.random.split(key, 9)

    x = jax.random.normal(ks[0], (N, Fx), jnp.float32)
    edge_attr = jax.random.normal(ks[1], (E, Fe), jnp.float32)
    u = jax.random.normal(ks[2], (B, Fu), jnp.float32)
    src = jax.random.randint(ks[3], (E,), 0, N, jnp.int32)
    dst = jax.random.randint(ks[4], (E,), 0, N, jnp.int32)
    edge_index = jnp.stack([src, dst], axis=0)
    batch = (jnp.arange(N, dtype=jnp.int32) * B) // N        # graph id per node

    # Deterministic synthetic parameters (module __init__ only defines shapes).
    w1 = jax.random.normal(ks[5], (F, H), jnp.float32) * 0.1   # Linear(F -> H)
    b1 = jax.random.normal(ks[6], (H,), jnp.float32) * 0.1
    w2 = jax.random.normal(ks[7], (H, Fx), jnp.float32) * 0.1  # Linear(H -> Fx)
    b2 = jax.random.normal(ks[8], (Fx,), jnp.float32) * 0.1
    params = (w1, b1, w2, b2)

    y, e_bar = node_model_forward(x, edge_index, edge_attr, u, batch, params,
                                  tile_n=16)
    y = jax.block_until_ready(y)
    e_bar = jax.block_until_ready(e_bar)

    y_ref, e_ref = _reference(x, edge_index, edge_attr, u, batch, params)
    assert y.shape == (N, Fx) and e_bar.shape == (N, Fe)
    assert jnp.allclose(e_bar, e_ref, atol=1e-5, rtol=1e-5), (e_bar, e_ref)
    assert jnp.allclose(y, y_ref, atol=1e-5, rtol=1e-5), (y, y_ref)

    print("KERNEL_OK")
</pallas_src>

<mosaic_0001>
module attributes {stable_mosaic.version = 11 : i64} {
  func.func @node_model_kernel(%arg0: i32, %arg1: memref<1x96xi32, #tpu.memory_space<vmem>>, %arg2: memref<16x1xi32, #tpu.memory_space<vmem>>, %arg3: memref<16x7xf32, #tpu.memory_space<vmem>>, %arg4: memref<96x5xf32, #tpu.memory_space<vmem>>, %arg5: memref<4x8xf32, #tpu.memory_space<vmem>>, %arg6: memref<7x32xf32, #tpu.memory_space<vmem>>, %arg7: memref<4x32xf32, #tpu.memory_space<vmem>>, %arg8: memref<8x32xf32, #tpu.memory_space<vmem>>, %arg9: memref<1x32xf32, #tpu.memory_space<vmem>>, %arg10: memref<32x7xf32, #tpu.memory_space<vmem>>, %arg11: memref<1x7xf32, #tpu.memory_space<vmem>>, %arg12: memref<16x7xf32, #tpu.memory_space<vmem>>, %arg13: memref<16x4xf32, #tpu.memory_space<vmem>>) attributes {dimension_semantics = [#tpu.dimension_semantics<parallel>], iteration_bounds = array<i64: 3>, scalar_prefetch = 0 : i64, scratch_operands = 0 : i64, tpu.core_type = #tpu.core_type<tc>, window_params = [{pipeline_mode = #tpu.pipeline_mode<synchronous>, transform_indices = @transform_0, window_bounds = array<i64: 1, 96>}, {transform_indices = @transform_1, window_bounds = array<i64: 16, 1>}, {transform_indices = @transform_2, window_bounds = array<i64: 16, 7>}, {pipeline_mode = #tpu.pipeline_mode<synchronous>, transform_indices = @transform_3, window_bounds = array<i64: 96, 5>}, {pipeline_mode = #tpu.pipeline_mode<synchronous>, transform_indices = @transform_4, window_bounds = array<i64: 4, 8>}, {pipeline_mode = #tpu.pipeline_mode<synchronous>, transform_indices = @transform_5, window_bounds = array<i64: 7, 32>}, {pipeline_mode = #tpu.pipeline_mode<synchronous>, transform_indices = @transform_6, window_bounds = array<i64: 4, 32>}, {pipeline_mode = #tpu.pipeline_mode<synchronous>, transform_indices = @transform_7, window_bounds = array<i64: 8, 32>}, {pipeline_mode = #tpu.pipeline_mode<synchronous>, transform_indices = @transform_8, window_bounds = array<i64: 1, 32>}, {pipeline_mode = #tpu.pipeline_mode<synchronous>, transform_indices = @transform_9, window_bounds = array<i64: 32, 7>}, {pipeline_mode = #tpu.pipeline_mode<synchronous>, transform_indices = @transform_10, window_bounds = array<i64: 1, 7>}, {transform_indices = @transform_11, window_bounds = array<i64: 16, 7>}, {transform_indices = @transform_12, window_bounds = array<i64: 16, 4>}]} {
    %c0 = arith.constant 0 : index
    %c0_0 = arith.constant 0 : index
    %0 = vector.load %arg1[%c0, %c0_0] : memref<1x96xi32, #tpu.memory_space<vmem>>, vector<1x96xi32>
    %c0_1 = arith.constant 0 : index
    %c0_2 = arith.constant 0 : index
    %1 = vector.load %arg2[%c0_1, %c0_2] : memref<16x1xi32, #tpu.memory_space<vmem>>, vector<16x1xi32>
    %c0_3 = arith.constant 0 : index
    %c0_4 = arith.constant 0 : index
    %2 = vector.load %arg3[%c0_3, %c0_4] : memref<16x7xf32, #tpu.memory_space<vmem>>, vector<16x7xf32>
    %c0_5 = arith.constant 0 : index
    %c0_6 = arith.constant 0 : index
    %3 = vector.load %arg4[%c0_5, %c0_6] : memref<96x5xf32, #tpu.memory_space<vmem>>, vector<96x5xf32>
    %c0_7 = arith.constant 0 : index
    %c0_8 = arith.constant 0 : index
    %4 = vector.load %arg5[%c0_7, %c0_8] : memref<4x8xf32, #tpu.memory_space<vmem>>, vector<4x8xf32>
    %5 = tpu.iota {dimensions = array<i32: 0>} : vector<16x96xi32>
    %c16_i32 = arith.constant 16 : i32
    %6 = arith.muli %arg0, %c16_i32 : i32
    %7 = vector.broadcast %6 : i32 to vector<16x96xi32>
    %8 = arith.addi %5, %7 : vector<16x96xi32>
    %9 = vector.broadcast %0 : vector<1x96xi32> to vector<16x96xi32>
    %10 = arith.cmpi eq, %8, %9 : vector<16x96xi32>
    %11 = arith.extui %10 : vector<16x96xi1> to vector<16x96xi32>
    %12 = arith.sitofp %11 : vector<16x96xi32> to vector<16x96xf32>
    %cst = arith.constant dense<0.000000e+00> : vector<16x5xf32>
    %13 = tpu.matmul %12, %3, %cst {dimension_numbers = #tpu.dot_dimension_numbers<[1], [0], [0], [1], [0, 0, 1, 1], [], []>} : vector<16x96xf32>, vector<96x5xf32>, vector<16x5xf32> -> vector<16x5xf32>
    %14 = vector.extract_strided_slice %13 {offsets = [0, 4], sizes = [16, 1], strides = [1, 1]} : vector<16x5xf32> to vector<16x1xf32>
    %cst_9 = arith.constant 1.000000e+00 : f32
    %15 = vector.broadcast %cst_9 : f32 to vector<16x1xf32>
    %16 = arith.maximumf %14, %15 : vector<16x1xf32>
    %17 = tpu.reciprocal %16 : vector<16x1xf32> -> vector<16x1xf32>
    %18 = vector.extract_strided_slice %13 {offsets = [0, 0], sizes = [16, 4], strides = [1, 1]} : vector<16x5xf32> to vector<16x4xf32>
    %19 = vector.broadcast %17 : vector<16x1xf32> to vector<16x4xf32>
    %20 = arith.mulf %18, %19 : vector<16x4xf32>
    %c0_10 = arith.constant 0 : index
    %c0_11 = arith.constant 0 : index
    %21 = vector.load %arg13[%c0_10, %c0_11] : memref<16x4xf32, #tpu.memory_space<vmem>>, vector<16x4xf32>
    tpu.vector_store %arg13[%c0_10, %c0_11], %20 {strides = array<i32>} : memref<16x4xf32, #tpu.memory_space<vmem>>, vector<16x4xf32>,
    %22 = tpu.iota {dimensions = array<i32: 1>} : vector<16x4xi32>
    %23 = vector.broadcast %1 : vector<16x1xi32> to vector<16x4xi32>
    %24 = arith.cmpi eq, %22, %23 : vector<16x4xi32>
    %25 = arith.extui %24 : vector<16x4xi1> to vector<16x4xi32>
    %26 = arith.sitofp %25 : vector<16x4xi32> to vector<16x4xf32>
    %cst_12 = arith.constant dense<0.000000e+00> : vector<16x8xf32>
    %27 = tpu.matmul %26, %4, %cst_12 {dimension_numbers = #tpu.dot_dimension_numbers<[1], [0], [0], [1], [0, 0, 1, 1], [], []>} : vector<16x4xf32>, vector<4x8xf32>, vector<16x8xf32> -> vector<16x8xf32>
    %c0_13 = arith.constant 0 : index
    %c0_14 = arith.constant 0 : index
    %28 = vector.load %arg6[%c0_13, %c0_14] : memref<7x32xf32, #tpu.memory_space<vmem>>, vector<7x32xf32>
    %cst_15 = arith.constant dense<0.000000e+00> : vector<16x32xf32>
    %29 = tpu.matmul %2, %28, %cst_15 {dimension_numbers = #tpu.dot_dimension_numbers<[1], [0], [0], [1], [0, 0, 1, 1], [], []>} : vector<16x7xf32>, vector<7x32xf32>, vector<16x32xf32> -> vector<16x32xf32>
    %c0_16 = arith.constant 0 : index
    %c0_17 = arith.constant 0 : index
    %30 = vector.load %arg7[%c0_16, %c0_17] : memref<4x32xf32, #tpu.memory_space<vmem>>, vector<4x32xf32>
    %cst_18 = arith.constant dense<0.000000e+00> : vector<16x32xf32>
    %31 = tpu.matmul %20, %30, %cst_18 {dimension_numbers = #tpu.dot_dimension_numbers<[1], [0], [0], [1], [0, 0, 1, 1], [], []>} : vector<16x4xf32>, vector<4x32xf32>, vector<16x32xf32> -> vector<16x32xf32>
    %32 = arith.addf %29, %31 : vector<16x32xf32>
    %c0_19 = arith.constant 0 : index
    %c0_20 = arith.constant 0 : index
    %33 = vector.load %arg8[%c0_19, %c0_20] : memref<8x32xf32, #tpu.memory_space<vmem>>, vector<8x32xf32>
    %cst_21 = arith.constant dense<0.000000e+00> : vector<16x32xf32>
    %34 = tpu.matmul %27, %33, %cst_21 {dimension_numbers = #tpu.dot_dimension_numbers<[1], [0], [0], [1], [0, 0, 1, 1], [], []>} : vector<16x8xf32>, vector<8x32xf32>, vector<16x32xf32> -> vector<16x32xf32>
    %35 = arith.addf %32, %34 : vector<16x32xf32>
    %c0_22 = arith.constant 0 : index
    %c0_23 = arith.constant 0 : index
    %36 = vector.load %arg9[%c0_22, %c0_23] : memref<1x32xf32, #tpu.memory_space<vmem>>, vector<1x32xf32>
    %37 = vector.broadcast %36 : vector<1x32xf32> to vector<16x32xf32>
    %38 = arith.addf %35, %37 : vector<16x32xf32>
    %cst_24 = arith.constant 0.000000e+00 : f32
    %39 = vector.broadcast %cst_24 : f32 to vector<16x32xf32>
    %40 = arith.maximumf %38, %39 : vector<16x32xf32>
    %c0_25 = arith.constant 0 : index
    %c0_26 = arith.constant 0 : index
    %41 = vector.load %arg10[%c0_25, %c0_26] : memref<32x7xf32, #tpu.memory_space<vmem>>, vector<32x7xf32>
    %cst_27 = arith.constant dense<0.000000e+00> : vector<16x7xf32>
    %42 = tpu.matmul %40, %41, %cst_27 {dimension_numbers = #tpu.dot_dimension_numbers<[1], [0], [0], [1], [0, 0, 1, 1], [], []>} : vector<16x32xf32>, vector<32x7xf32>, vector<16x7xf32> -> vector<16x7xf32>
    %c0_28 = arith.constant 0 : index
    %c0_29 = arith.constant 0 : index
    %43 = vector.load %arg11[%c0_28, %c0_29] : memref<1x7xf32, #tpu.memory_space<vmem>>, vector<1x7xf32>
    %44 = vector.broadcast %43 : vector<1x7xf32> to vector<16x7xf32>
    %45 = arith.addf %42, %44 : vector<16x7xf32>
    %cst_30 = arith.constant 0.000000e+00 : f32
    %46 = vector.broadcast %cst_30 : f32 to vector<16x7xf32>
    %47 = arith.maximumf %45, %46 : vector<16x7xf32>
    %c0_31 = arith.constant 0 : index
    %c0_32 = arith.constant 0 : index
    %48 = vector.load %arg12[%c0_31, %c0_32] : memref<16x7xf32, #tpu.memory_space<vmem>>, vector<16x7xf32>
    tpu.vector_store %arg12[%c0_31, %c0_32], %47 {strides = array<i32>} : memref<16x7xf32, #tpu.memory_space<vmem>>, vector<16x7xf32>,
    return
  }
  func.func @transform_0(%arg0: i32) -> (i32, i32) {
    %c0_i32 = arith.constant 0 : i32
    %c0_i32_0 = arith.constant 0 : i32
    %c0_i32_1 = arith.constant 0 : i32
    return %c0_i32, %c0_i32_0 : i32, i32
  }
  func.func @transform_1(%arg0: i32) -> (i32, i32) {
    %c0_i32 = arith.constant 0 : i32
    %c0_i32_0 = arith.constant 0 : i32
    return %arg0, %c0_i32 : i32, i32
  }
  func.func @transform_2(%arg0: i32) -> (i32, i32) {
    %c0_i32 = arith.constant 0 : i32
    %c0_i32_0 = arith.constant 0 : i32
    return %arg0, %c0_i32 : i32, i32
  }
  func.func @transform_3(%arg0: i32) -> (i32, i32) {
    %c0_i32 = arith.constant 0 : i32
    %c0_i32_0 = arith.constant 0 : i32
    %c0_i32_1 = arith.constant 0 : i32
    return %c0_i32, %c0_i32_0 : i32, i32
  }
  func.func @transform_4(%arg0: i32) -> (i32, i32) {
    %c0_i32 = arith.constant 0 : i32
    %c0_i32_0 = arith.constant 0 : i32
    %c0_i32_1 = arith.constant 0 : i32
    return %c0_i32, %c0_i32_0 : i32, i32
  }
  func.func @transform_5(%arg0: i32) -> (i32, i32) {
    %c0_i32 = arith.constant 0 : i32
    %c0_i32_0 = arith.constant 0 : i32
    %c0_i32_1 = arith.constant 0 : i32
    return %c0_i32, %c0_i32_0 : i32, i32
  }
  func.func @transform_6(%arg0: i32) -> (i32, i32) {
    %c0_i32 = arith.constant 0 : i32
    %c0_i32_0 = arith.constant 0 : i32
    %c0_i32_1 = arith.constant 0 : i32
    return %c0_i32, %c0_i32_0 : i32, i32
  }
  func.func @transform_7(%arg0: i32) -> (i32, i32) {
    %c0_i32 = arith.constant 0 : i32
    %c0_i32_0 = arith.constant 0 : i32
    %c0_i32_1 = arith.constant 0 : i32
    return %c0_i32, %c0_i32_0 : i32, i32
  }
  func.func @transform_8(%arg0: i32) -> (i32, i32) {
    %c0_i32 = arith.constant 0 : i32
    %c0_i32_0 = arith.constant 0 : i32
    %c0_i32_1 = arith.constant 0 : i32
    return %c0_i32, %c0_i32_0 : i32, i32
  }
  func.func @transform_9(%arg0: i32) -> (i32, i32) {
    %c0_i32 = arith.constant 0 : i32
    %c0_i32_0 = arith.constant 0 : i32
    %c0_i32_1 = arith.constant 0 : i32
    return %c0_i32, %c0_i32_0 : i32, i32
  }
  func.func @transform_10(%arg0: i32) -> (i32, i32) {
    %c0_i32 = arith.constant 0 : i32
    %c0_i32_0 = arith.constant 0 : i32
    %c0_i32_1 = arith.constant 0 : i32
    return %c0_i32, %c0_i32_0 : i32, i32
  }
  func.func @transform_11(%arg0: i32) -> (i32, i32) {
    %c0_i32 = arith.constant 0 : i32
    %c0_i32_0 = arith.constant 0 : i32
    return %arg0, %c0_i32 : i32, i32
  }
  func.func @transform_12(%arg0: i32) -> (i32, i32) {
    %c0_i32 = arith.constant 0 : i32
    %c0_i32_0 = arith.constant 0 : i32
    return %arg0, %c0_i32 : i32, i32
  }
}

</mosaic_0001>

<bundles_post_ra>
// kernel: tpu_custom_call.1
= control target key start
LH: loop header
LB: loop body
LE: loop exit
PB: predicated region body
PF: predicated region fallthrough
CT: control target
= control target key end

     0   :  { %s1376_s21 = smov 0   ;;  %s1497_s0 = inlined_call_operand.vmem [shape: s32[1,96], index: 0, kind: input, shape index: {}]   ;;  %s1498_s1 = inlined_call_operand.vmem [shape: s32[48,1], index: 1, kind: input, shape index: {}]   ;;  %s1499_s2 = inlined_call_operand.vmem [shape: f32[48,7], index: 2, kind: input, shape index: {}]   ;;  %s1500_s3 = inlined_call_operand.vmem [shape: f32[96,5], index: 3, kind: input, shape index: {}]   ;;  %s1501_s4 = inlined_call_operand.vmem [shape: f32[4,8], index: 4, kind: input, shape index: {}]   ;;  %s1502_s5 = inlined_call_operand.vmem [shape: f32[7,32], index: 5, kind: input, shape index: {}]   ;;  %s1503_s6 = inlined_call_operand.vmem [shape: f32[4,32], index: 6, kind: input, shape index: {}]   ;;  %s1504_s7 = inlined_call_operand.vmem [shape: f32[8,32], index: 7, kind: input, shape index: {}]   ;;  %s1505_s8 = inlined_call_operand.vmem [shape: f32[1,32], index: 8, kind: input, shape index: {}]   ;;  %s1506_s9 = inlined_call_operand.vmem [shape: f32[32,7], index: 9, kind: input, shape index: {}]   ;;  %s1507_s10 = inlined_call_operand.vmem [shape: f32[1,7], index: 10, kind: input, shape index: {}]   ;;  %s1508_s11 = inlined_call_operand.vmem [shape: f32[48,7], index: 11, kind: output, shape index: {0}]   ;;  %s1509_s12 = inlined_call_operand.vmem [shape: f32[48,4], index: 12, kind: output, shape index: {1}]  }
   0x1 LB: > { %s1155_s22 = sadd.s32 4294967295, %s1306_s21   ;;  %p1159_p0 = scmp.ge.s32.totalorder %s1306_s21, 1  ;;  %s1306_s21 = sphi %s1376_s21, %s23_s21  }
   0x2   : > { %p377_p1 = scmp.lt.s32.totalorder %s1306_s21, 4 }
   0x4   : > { %p378_p2 = pnand %p1159_p0, %p377_p1 }
   0x5   : > { %s1390_s27 = sshll.u32 (!%p378_p2), %s1155_s22, 4  ;;  %s1160_s28 = sshll.u32 (!%p378_p2), %s1155_s22, 1 }
   0x6   : > { %381 = sbr.rel (%p378_p2) target bundleno = 787 (0x313), region = 64  ;;  %p430_p3 = scmp.lt.s32.totalorder (!%p378_p2), %s1160_s28, 5 }
   0xb   : > { %v469_v0 = vld [vmem:[%s1500_s3 + $0x58] sm:$0xff]  ;;  %v468_v1 = vld [vmem:[%s1500_s3 + $0x50] sm:$0xff]  ;;  %v471_v2 = vlaneseq  ;;  %v475_v3 = vstv %s1390_s27  ;;  %v467_v4 = vld [vmem:[%s1500_s3 + $0x48] sm:$0xff]  ;;  %v1308_v6 = vmov 0   ;;  %s1511_s28 = smov (!%p430_p3, %s1160_s28), 5  ;;  %vm488_vm0 = vcmask 785408  }
   0xc   : > { %1225 = vmatprep.subr.mxu0 %v469_v0  ;;  %1294 = vset.pattern.permute.xlu0 %v1308_v6  ;;  %v466_v7 = vld [vmem:[%s1500_s3 + $0x40] sm:$0xff]  ;;  %v465_v10 = vld [vmem:[%s1500_s3 + $0x38] sm:$0xff]  ;;  %s1406_s19 = sshll.u32 %s1511_s28, 3  ;;  %v1309_v11 = vmov 0.0   ;;  %v464_v13 = vld [vmem:[%s1500_s3 + $0x30] sm:$0xff]  ;;  %vm609_vm2 = vcmask 1043456  }
   0xd   : > { %1226 = vmatpush3.msra.mxu0 %v469_v0  ;;  %v472_v5 = vshrl.u32 %v471_v2, 7  ;;  %v1169_v8 = vld [vmem:[%s1497_s0] ss:$0 sm:$0xff]  ;;  %s433_s23 = scalar_lea.vmem %s1498_s1, %s1406_s19  ;;  %v463_v15 = vld [vmem:[%s1500_s3 + $0x28] sm:$0xff]  ;;  %v461_v20 = vld [vmem:[%s1500_s3 + $0x18] sm:$0xff]  ;;  %v1310_v26 = vmov 4   ;;  %s451_s30 = scalar_lea.vmem %s1509_s12, %s1406_s19 }
   0xe   : > { %1227 = vmatprep.subr.mxu0 %v468_v1  ;;  %v454_v14 = vld [vmem:[%s433_s23] sm:$0xff]  ;;  %v455_v16 = vld [vmem:[%s433_s23 + $0x8] sm:$0xff]  ;;  %v460_v22 = vld [vmem:[%s1500_s3 + $0x10] sm:$0xff]  ;;  %1295 = vset.pattern.permute.xlu1 %v1310_v26  ;;  %v590_v27 = vand.u32 127, %v471_v2  ;;  %vm586_vm4 = vcmask 31744   ;;  %vm781_vm7 = vcmask 1046528   ;;  %s439_s15 = scalar_lea.vmem %s1499_s2, %s1406_s19  ;;  %s445_s16 = scalar_lea.vmem %s1508_s11, %s1406_s19 }
   0xf   : > { %1228 = vmatpush3.msra.mxu0 %v468_v1  ;;  %v476_v9 = vadd.s32 %v475_v3, %v472_v5  ;;  %592 = vperm.xlu0 %1294, %v454_v14   ;;  %v470_v17 = vld [vmem:[%s1501_s4] sm:$0xf]  ;;  %v473_v18 = vadd.s32 8, %v472_v5  ;;  %v459_v23 = vld [vmem:[%s1500_s3 + $0x8] sm:$0xff]  ;;  %vm774_vm8 = vcmask 56320   ;;  %vm861_vm9 = vcmask 64512  }
  0x10   : > { %1229 = vmatprep.subr.mxu0 %v467_v4  ;;  %1252 = vmatprep.subr.msk.mxu1 %vm609_vm2, %v470_v17  ;;  %v462_v19 = vld [vmem:[%s1500_s3 + $0x20] sm:$0xff]  ;;  %v457_v47 = vld [vmem:[%s439_s15 + $0x8] sm:$0xff]  ;;  %v959_v49 = vld [vmem:[%s1506_s9 + $0x18] sm:$0xff]  ;;  %vm967_vm10 = vcmask 261120  }
  0x11   : > { %1230 = vmatpush3.msra.mxu0 %v467_v4  ;;  %vm482_vm1 = vcmp.eq.s32.totalorder %v476_v9, %v1169_v8  ;;  %1253 = vmatpush3.msk.msra.mxu1 %vm609_vm2, %v470_v17  ;;  %v477_v21 = vadd.s32 %v475_v3, %v473_v18  ;;  %v458_v24 = vld [vmem:[%s1500_s3] sm:$0xff]  ;;  %v958_v50 = vld [vmem:[%s1506_s9 + $0x10] sm:$0xff]  ;;  %v957_v51 = vld [vmem:[%s1506_s9 + $0x8] sm:$0xff] }
  0x12   : > { %1231 = vmatprep.subr.mxu0 %v466_v7  ;;  %v1170_v12 = vsel %vm482_vm1, 1.0, %v1309_v11  ;;  %v689_v36 = vld [vmem:[%s1503_s6] sm:$0xf] }
  0x13   : > { %1232 = vmatpush3.msra.mxu0 %v466_v7  ;;  %1249 = vmatprep.mubr.msk.f32.mxu0 %vm488_vm0, %v1170_v12  ;;  %vm483_vm3 = vcmp.eq.s32.totalorder %v477_v21, %v1169_v8  ;;  %v688_v38 = vld [vmem:[%s1502_s5] sm:$0x7f] }
  0x14   : > { %1233 = vmatprep.subr.mxu0 %v465_v10  ;;  %595 = vperm.xlu0 %1294, %v455_v16   ;;  %v1171_v25 = vsel %vm483_vm3, 1.0, %v1309_v11  ;;  %v456_v44 = vld [vmem:[%s439_s15] sm:$0xff] }
  0x15   : > { %1234 = vmatpush3.msra.mxu0 %v465_v10  ;;  %1257 = vmatprep.subr.msk.mxu1 %vm609_vm2, %v689_v36  ;;  %v860_v45 = vld [vmem:[%s1504_s7] sm:$0xff] }
  0x16   : > { %1235 = vmatprep.subr.mxu0 %v464_v13  ;;  %v956_v52 = vld [vmem:[%s1506_s9] sm:$0xff] }
  0x17   : > { %1236 = vmatpush3.msra.mxu0 %v464_v13  ;;  %v1187_v61 = vld [vmem:[%s1505_s8] ss:$0 sm:$0xff] }
  0x18   : > { %1237 = vmatprep.subr.mxu0 %v463_v15  ;;  %v1188_v4 = vld [vmem:[%s1507_s10] ss:$0 sm:$0xff] }
  0x19   : > { %1238 = vmatpush3.msra.mxu0 %v463_v15 }
  0x1a   : > { %1239 = vmatprep.subr.mxu0 %v462_v19 }
  0x1b   : > { %1240 = vmatpush3.msra.mxu0 %v462_v19 }
  0x1c   : > { %1241 = vmatprep.subr.mxu0 %v461_v20 }
  0x1d   : > { %1242 = vmatpush3.msra.mxu0 %v461_v20 }
  0x1e   : > { %1243 = vmatprep.subr.mxu0 %v460_v22 }
  0x1f   : > { %1244 = vmatpush3.msra.mxu0 %v460_v22 }
  0x20   : > { %1245 = vmatprep.subr.mxu0 %v459_v23 }
  0x21   : > { %1246 = vmatpush3.msra.mxu0 %v459_v23 }
  0x22   : > { %1247 = vmatprep.subr.mxu0 %v458_v24 }
  0x23   : > { %1248 = vmatpush3.msra.mxu0 %v458_v24 }
  0x24   : > { %1250 = vmatmul.mubr.msk.f32.vlgmr.msra.gmra.mxu0 %vm488_vm0, %v1171_v25 }
  0x8a   : > { %v593_v28 = vpop.permute.xlu0 %592 }
  0x8b   : > { %vm597_vm5 = vcmp.eq.s32.totalorder %v590_v27, %v593_v28 }
  0x8c   : > { %v1174_v29 = vsel %vm597_vm5, 1.0, %v1309_v11 }
  0x8d   : > { %1254 = vmatprep.mubr.msk.f32.mxu1 %vm586_vm4, %v1174_v29 }
  0x8f   : > { %v596_v30 = vpop.permute.xlu0 %595 }
  0x90   : > { %vm598_vm6 = vcmp.eq.s32.totalorder %v590_v27, %v596_v30 }
  0x91   : > { %v1175_v31 = vsel %vm598_vm6, 1.0, %v1309_v11 }
  0x92   : > { %1255 = vmatmul.mubr.msk.f32.vlgmr.msra.gmra.mxu1 %vm586_vm4, %v1175_v31 }
  0x93   : > { %1258 = vmatpush3.msk.msra.mxu1 %vm609_vm2, %v689_v36 }
  0x94   : > { %1262 = vmatprep.subr.msk.mxu1 %vm781_vm7, %v688_v38 }
  0xe4   : > { %v1251_v32 = vpop.f32.mrf.mxu0 }
  0xe5   : > { %v571_v35 = vmax.f32 %v1251_v32, 1.0 }
  0xe6   : > { %v561_v33 = vpop.f32.mrf.mxu0 }
  0xe7   : > { %v570_v34 = vmax.f32 %v561_v33, 1.0 }
  0xe9   : > { %1296 = vrcp.f32 %v570_v34 }
  0xea   : > { %1298 = vrcp.f32 %v571_v35 }
  0xf6   : > { %v1297_v37 = vpop.eup %1296 }
  0xf7   : > { %576 = vperm.xlu1 %1295, %v1297_v37   ;;  %v1299_v39 = vpop.eup %1298 }
  0xfb   : > { %581 = vperm.xlu1 %1295, %v1299_v39  }
 0x152   : > { %v1256_v46 = vpop.f32.mrf.mxu1 }
 0x154   : > { %v679_v48 = vpop.f32.mrf.mxu1 }
 0x172   : > { %v577_v40 = vpop.permute.xlu1 %576 }
 0x173   : > { %v584_v41 = vmul.f32 %v577_v40, %v561_v33 }
 0x175   : > { %587 = vst.msk [vmem:[%s451_s30] sm:$0xff] %vm586_vm4, %v584_v41  ;;  %1259 = vmatprep.mubr.msk.f32.mxu1 %vm586_vm4, %v584_v41 }
 0x176   : > { %v582_v42 = vpop.permute.xlu1 %581 }
 0x177   : > { %v585_v43 = vmul.f32 %v1251_v32, %v582_v42 }
 0x179   : > { %588 = vst.msk [vmem:[%s451_s30 + $0x8] sm:$0xff] %vm586_vm4, %v585_v43  ;;  %1260 = vmatmul.mubr.msk.f32.vlgmr.msra.gmra.mxu1 %vm586_vm4, %v585_v43 }
 0x17a   : > { %1263 = vmatpush3.msk.msra.mxu1 %vm781_vm7, %v688_v38  ;;  %1264 = vmatprep.mubr.msk.f32.mxu1 %vm774_vm8, %v456_v44 }
 0x17b   : > { %1267 = vmatprep.subr.mxu1 %v860_v45 }
 0x17d   : > { %1265 = vmatmul.mubr.msk.f32.vlgmr.msra.gmra.mxu1 %vm774_vm8, %v457_v47 }
 0x17e   : > { %1268 = vmatpush3.msra.mxu1 %v860_v45  ;;  %1269 = vmatprep.mubr.msk.f32.mxu1 %vm861_vm9, %v679_v48 }
 0x17f   : > { %1272 = vmatprep.subr.mxu1 %v959_v49 }
 0x181   : > { %1270 = vmatmul.mubr.msk.f32.vlgmr.msra.gmra.mxu1 %vm861_vm9, %v1256_v46 }
 0x182   : > { %1273 = vmatpush3.msra.mxu1 %v959_v49 }
 0x183   : > { %1274 = vmatprep.subr.mxu1 %v958_v50 }
 0x184   : > { %1275 = vmatpush3.msra.mxu1 %v958_v50 }
 0x185   : > { %1276 = vmatprep.subr.mxu1 %v957_v51 }
 0x186   : > { %1277 = vmatpush3.msra.mxu1 %v957_v51 }
 0x187   : > { %1278 = vmatprep.subr.mxu1 %v956_v52 }
 0x188   : > { %1279 = vmatpush3.msra.mxu1 %v956_v52 }
 0x239   : > { %v1261_v53 = vpop.f32.mrf.mxu1 }
 0x23b   : > { %v765_v54 = vpop.f32.mrf.mxu1 }
 0x23d   : > { %v1266_v55 = vpop.f32.mrf.mxu1 }
 0x23e   : > { %v857_v57 = vadd.f32 %v1266_v55, %v1261_v53 }
 0x23f   : > { %v851_v56 = vpop.f32.mrf.mxu1 }
 0x240   : > { %v852_v59 = vadd.f32 %v851_v56, %v765_v54 }
 0x241   : > { %v1271_v58 = vpop.f32.mrf.mxu1 }
 0x242   : > { %v944_v60 = vadd.f32 %v1271_v58, %v857_v57 }
 0x243   : > { %v934_v62 = vpop.f32.mrf.mxu1 }
 0x244   : > { %v943_v63 = vadd.f32 %v934_v62, %v852_v59  ;;  %v953_v0 = vadd.f32 %v1187_v61, %v944_v60 }
 0x246   : > { %v952_v1 = vadd.f32 %v1187_v61, %v943_v63  ;;  %v955_v3 = vmax.f32 %v953_v0, 0.0 }
 0x248   : > { %v954_v2 = vmax.f32 %v952_v1, 0.0 }
 0x24a   : > { %1280 = vmatprep.mubr.msk.f32.mxu1 %vm967_vm10, %v954_v2 }
 0x24b   : > { %1281 = vmatmul.mubr.msk.f32.vlgmr.msra.gmra.mxu1 %vm967_vm10, %v955_v3 }
 0x30b   : > { %v1282_v5 = vpop.f32.mrf.mxu1 }
 0x30c   : > { %v1046_v6 = vadd.f32 %v1282_v5, %v1188_v4 }
 0x30d   : > { %v1040_v7 = vpop.f32.mrf.mxu1 }
 0x30e   : > { %v1041_v8 = vadd.f32 %v1188_v4, %v1040_v7  ;;  %v1050_v10 = vmax.f32 %v1046_v6, 0.0 }
 0x310   : > { %v1049_v9 = vmax.f32 %v1041_v8, 0.0  ;;  %1052 = vst.msk [vmem:[%s445_s16 + $0x8] sm:$0xff] %vm774_vm8, %v1050_v10 }
 0x312   : > { %1051 = vst.msk [vmem:[%s445_s16] sm:$0xff] %vm774_vm8, %v1049_v9 }
 0x313 PF: > { %s23_s21 = sadd.s32 1, %s1306_s21  }
 0x314   : > { %p20_p4 = scmp.ge.s32.totalorder %s23_s21, 5  }
 0x316   :  { %22 = sbr.rel (!%p20_p4) target bundleno = 1 (0x1), region = 109 }

</bundles_post_ra>
